<compile_context>
chip_gen: v5e
topology: v5e:2x2
jax: 0.10.0
libtpu: 0.0.40
codegen_flags: <defaults>
</compile_context>

<pallas_src>
import functools

import jax
import jax.numpy as jnp
from jax.experimental import pallas as pl
from jax.experimental.pallas import tpu as pltpu


def _round_up(x, m):
    return ((x + m - 1) // m) * m


def _vmem_per_core_bytes():
    """Best-effort per-TensorCore VMEM capacity (conservative when unknown)."""
    try:
        kind = jax.devices()[0].device_kind.lower()
    except Exception:
        kind = ""
    cap = None
    try:
        cap = int(pltpu.get_tpu_info().vmem_capacity_bytes)
    except Exception:
        cap = None
    if cap is None:
        # v4/v5e/v6e have 128 MiB per TensorCore; default to 64 MiB otherwise.
        cap = 128 * 1024 * 1024 if any(g in kind for g in ("v4", "v5", "v6")) \
            else 64 * 1024 * 1024
    if "7" in kind:
        # v7x: 64 MiB per TensorCore even if the query reports per-chip capacity.
        cap = min(cap, 64 * 1024 * 1024)
    return cap


def _session_readout_kernel(*refs, mask_mode, s_valid, approx_recip):
    """One batch tile per grid step.

    Refs (per grid step), in order:
      wblend_ref : SMEM f32[1, 1]    sigmoid(last_item_weight)
      x_ref      : VMEM [TB, S8, E]  hidden_states tile (f32 or bf16), S padded to 8
      pos_ref    : VMEM [S8, E]      position embeddings (resident)
      w1t_ref    : VMEM [E, Hp]      attention Linear1 weight^T, H zero-padded to 128
      b1_ref     : VMEM f32[1, Hp]   attention Linear1 bias (zero-padded)
      w2_ref     : VMEM [1, Hp]      attention Linear2 weight row (hidden dtype)
      len_ref    : VMEM i32[TB, 1]   sequence lengths tile
      mask_ref   : VMEM f32[TB, S8]  (only when mask_mode == "explicit")
      repr_ref   : VMEM f32[TB, Ep]  output session representation (lane-padded)
      attn_ref   : VMEM f32[TB, Sp]  output attention weights (lane-padded)
    """
    if mask_mode == "explicit":
        (wblend_ref, x_ref, pos_ref, w1t_ref, b1_ref, w2_ref, len_ref, mask_ref,
         repr_ref, attn_ref) = refs
    else:
        (wblend_ref, x_ref, pos_ref, w1t_ref, b1_ref, w2_ref, len_ref,
         repr_ref, attn_ref) = refs

    TB, S8, E = x_ref.shape
    Hp = w1t_ref.shape[1]
    Ep = repr_ref.shape[1]
    Sp = attn_ref.shape[1]

    w2 = w2_ref[...]                       # [1, Hp], hidden dtype
    hidden_dtype = w2.dtype

    # ---- attention scores: one MXU matmul + VPU/EUP/XLU epilogue -----------
    xp = x_ref[...] + pos_ref[...][None, :, :]            # [TB, S8, E]
    # S8 % 8 == 0 (wrapper pads S), so this reshape is a free sublane-only view.
    xp2 = xp.reshape(TB * S8, E)

    # Linear(E->H) with f32 MXU accumulation; Tanh in hidden_dtype (bf16 on
    # v6e/v7x halves the largest intermediate and doubles EUP tanh throughput).
    # TODO(synk): nn.Dropout is identity in eval mode; training dropout not implemented.
    h = jnp.tanh(
        (jnp.dot(xp2, w1t_ref[...], preferred_element_type=jnp.float32)
         + b1_ref[...]).astype(hidden_dtype)
    ).reshape(TB, S8, Hp)                                  # [TB, S8, Hp]

    # Linear(H->1, no bias) as broadcast-multiply + f32-accumulated lane reduce
    # (avoids an N=1 MXU matmul and a [TB*S,1] -> [TB,S] cross-lane relayout).
    scores = jnp.sum(h * w2[None, :, :], axis=-1, dtype=jnp.float32)   # [TB, S8]

    iota = jax.lax.broadcasted_iota(jnp.int32, (TB, S8), 1)
    neg = jnp.float32(-1.0e9)
    if mask_mode == "explicit":
        scores = jnp.where(mask_ref[...] == 0.0, neg, scores)
    elif mask_mode == "lengths":
        scores = jnp.where(iota < len_ref[...], scores, neg)
    elif S8 > s_valid:
        # "none" mode: only the wrapper-added S padding must be masked out.
        scores = jnp.where(iota < s_valid, scores, neg)

    # softmax over the sequence dim.
    m = jnp.max(scores, axis=-1, keepdims=True)
    e = jnp.exp(scores - m)
    denom = jnp.sum(e, axis=-1, keepdims=True)
    if approx_recip:
        attn = e * pl.reciprocal(denom, approx=True)       # EUP slot, ~1e-3 rel err
    else:
        attn = e / denom                                   # exact divide

    # ---- fused blend: a single weighted pass over x (no f32 copy of x) ------
    wblend = wblend_ref[0, 0]                              # sigmoid already applied
    last_idx = len_ref[...] - 1                            # [TB, 1]
    # torch negative-index semantics for length == 0 (selects position S-1).
    last_idx = jnp.where(last_idx < 0, last_idx + jnp.int32(s_valid), last_idx)
    onehot = (iota == last_idx).astype(jnp.float32)        # [TB, S8]
    coeff = (1.0 - wblend) * attn + wblend * onehot        # [TB, S8], sums to 1

    prod = x_ref[...] * coeff[:, :, None].astype(x_ref.dtype)   # stays in x dtype
    repr_f32 = jnp.sum(prod, axis=1, dtype=jnp.float32)         # [TB, E], f32 accum

    # ---- lane-dense stores (last dim padded to a multiple of 128) -----------
    if Sp > S8:
        attn = jnp.concatenate(
            [attn, jnp.zeros((TB, Sp - S8), jnp.float32)], axis=-1)
    attn_ref[...] = attn
    if Ep > E:
        repr_f32 = jnp.concatenate(
            [repr_f32, jnp.zeros((TB, Ep - E), jnp.float32)], axis=-1)
    repr_ref[...] = repr_f32


def session_readout(hidden_states, lengths, params, mask=None, *,
                    mask_mode="auto", compute_dtype=jnp.float32,
                    hidden_dtype=None, batch_tile=None, vmem_limit_bytes=None,
                    approx_softmax_recip=False):
    """Prepares operands, picks a generation-aware batch tile, calls the kernel.

    mask_mode:
      "auto"     -> "explicit" if a mask array is given, else "none"
      "explicit" -> use the provided [B, S] mask array (PyTorch semantics)
      "lengths"  -> build the standard (pos < length) mask in-kernel (no mask
                    HBM stream); only valid when the mask is the length mask.
      "none"     -> no masking (PyTorch mask=None semantics).
    """
    B, S, E = hidden_states.shape
    H = params["w1"].shape[0]
    if hidden_dtype is None:
        # bf16 h on v6e/v7x halves the largest intermediate; keep f32 on v5e
        # (no bf16 VPU/EUP) by leaving compute_dtype/hidden_dtype at f32 there.
        hidden_dtype = compute_dtype

    if mask_mode == "auto":
        mask_mode = "explicit" if mask is not None else "none"
    assert mask_mode in ("explicit", "lengths", "none")

    Hp = _round_up(H, 128)   # lane-dense hidden dim (exact: tanh(0) * 0 = 0)
    S8 = _round_up(S, 8)     # sublane pad -> the in-kernel reshape is a free view
    Sp = _round_up(S8, 128)  # lane-dense attn output (sliced back below)
    Ep = _round_up(E, 128)   # lane-dense repr output (sliced back below)

    cd = jnp.dtype(compute_dtype).itemsize
    hd = jnp.dtype(hidden_dtype).itemsize

    # ---- operands ------------------------------------------------------------
    x = hidden_states.astype(compute_dtype)
    pos = params["pos_table"][:S].astype(compute_dtype)
    if S8 > S:
        x = jnp.pad(x, ((0, 0), (0, S8 - S), (0, 0)))
        pos = jnp.pad(pos, ((0, S8 - S), (0, 0)))

    w1_t = jnp.zeros((E, Hp), compute_dtype).at[:, :H].set(
        params["w1"].T.astype(compute_dtype))                              # [E, Hp]
    b1 = jnp.zeros((1, Hp), jnp.float32).at[:, :H].set(
        params["b1"].reshape(1, H).astype(jnp.float32))                    # [1, Hp]
    w2 = jnp.zeros((1, Hp), hidden_dtype).at[:, :H].set(
        params["w2"].reshape(1, H).astype(hidden_dtype))                   # [1, Hp]

    len_2d = lengths.astype(jnp.int32).reshape(B, 1)
    # sigmoid of the single scalar parameter is done here, not in the kernel.
    wblend = jax.nn.sigmoid(
        params["last_item_weight"].astype(jnp.float32)).reshape(1, 1)

    args = [wblend, x, pos, w1_t, b1, w2, len_2d]
    if mask_mode == "explicit":
        mask_p = mask.astype(jnp.float32)
        if S8 > S:
            mask_p = jnp.pad(mask_p, ((0, 0), (0, S8 - S)))
        args.append(mask_p)

    # ---- generation-aware VMEM budget -> batch tile ---------------------------
    vmem_cap = _vmem_per_core_bytes()
    if vmem_cap <= 80 * 1024 * 1024:          # v7x-class: 64 MiB per TensorCore
        footprint_budget = 40 * 1024 * 1024
        default_vmem_limit = 56 * 1024 * 1024
    else:                                     # v5e / v6e: 128 MiB per TensorCore
        footprint_budget = 88 * 1024 * 1024
        default_vmem_limit = 100 * 1024 * 1024
    if vmem_limit_bytes is None:
        vmem_limit_bytes = default_vmem_limit

    # FULL per-batch-row footprint (review item): double-buffered x, xp, the
    # x*coeff product, h [S8, Hp] and its f32-accumulated reduce, the
    # double-buffered outputs and small per-row vectors.
    row_bytes = (2 * S8 * E * cd             # x tile, double-buffered
                 + S8 * E * cd               # xp = x + pos
                 + S8 * E * 4                # x * coeff product (worst case f32)
                 + S8 * Hp * hd              # h (tanh activations)
                 + S8 * Hp * 4               # pre-reduce product / f32 accumulation
                 + 2 * (Sp + Ep) * 4         # double-buffered outputs
                 + 8 * S8 * 4)               # scores / attn / coeff / onehot / iota
    if mask_mode == "explicit":
        row_bytes += 2 * S8 * 4              # double-buffered mask tile
    resident_bytes = S8 * E * cd + E * Hp * cd + Hp * 4 + Hp * hd + 4096

    if batch_tile is None:
        tb = max(1, (footprint_budget - resident_bytes) // row_bytes)
        tb = min(tb, B, 1024)
        if tb >= B and B >= 16:
            tb = (B + 1) // 2   # >= 2 grid steps so both v7x TensorCores get work
    else:
        tb = min(int(batch_tile), B)
    if tb < B:
        tb = max(8, (tb // 8) * 8)           # sublane-align partial-batch blocks
    else:
        tb = B
    grid = (pl.cdiv(B, tb),)

    kernel = functools.partial(_session_readout_kernel, mask_mode=mask_mode,
                               s_valid=S, approx_recip=approx_softmax_recip)
    out_shape = (jax.ShapeDtypeStruct((B, Ep), jnp.float32),
                 jax.ShapeDtypeStruct((B, Sp), jnp.float32))

    def build_call(single_buffer_weights):
        # Constant-index weights stay resident in VMEM across the whole grid;
        # single-buffer them when supported to free VMEM for a larger x tile.
        wkw = {"pipeline_mode": pl.Buffered(1)} if single_buffer_weights else {}
        in_specs = [
            pl.BlockSpec((1, 1), lambda b: (0, 0),
                         memory_space=pltpu.MemorySpace.SMEM),       # sigmoid(lw)
            pl.BlockSpec((tb, S8, E), lambda b: (b, 0, 0)),          # hidden_states
            pl.BlockSpec((S8, E), lambda b: (0, 0), **wkw),          # pos emb
            pl.BlockSpec((E, Hp), lambda b: (0, 0), **wkw),          # W1^T
            pl.BlockSpec((1, Hp), lambda b: (0, 0), **wkw),          # b1
            pl.BlockSpec((1, Hp), lambda b: (0, 0), **wkw),          # w2 row
            pl.BlockSpec((tb, 1), lambda b: (b, 0)),                 # lengths
        ]
        if mask_mode == "explicit":
            in_specs.append(pl.BlockSpec((tb, S8), lambda b: (b, 0)))  # mask
        out_specs = (
            pl.BlockSpec((tb, Ep), lambda b: (b, 0)),                # session_repr
            pl.BlockSpec((tb, Sp), lambda b: (b, 0)),                # attn_weights
        )
        return pl.pallas_call(
            kernel,
            out_shape=out_shape,
            grid=grid,
            in_specs=in_specs,
            out_specs=out_specs,
            compiler_params=pltpu.CompilerParams(
                dimension_semantics=("parallel",),   # batch tiles split across cores
                vmem_limit_bytes=vmem_limit_bytes,
            ),
        )

    try:
        sess_p, attn_p = build_call(True)(*args)
    except Exception:
        # pipeline_mode=pl.Buffered(1) unsupported on this jax build: fall back
        # to default double-buffered resident weights (identical results).
        sess_p, attn_p = build_call(False)(*args)

    sess = sess_p[:, :E] if Ep > E else sess_p
    attn = attn_p[:, :S] if Sp > S else attn_p
    return sess, attn


def session_readout_ref(hidden_states, lengths, params, mask=None):
    """Pure-JAX reference mirroring the PyTorch forward (eval mode)."""
    B, S, E = hidden_states.shape
    pos_emb = params["pos_table"][:S][None]              # [1, S, E]
    hp = hidden_states + pos_emb
    h = jnp.tanh(hp @ params["w1"].T + params["b1"])
    scores = (h @ params["w2"].T).squeeze(-1)            # [B, S]
    if mask is not None:
        scores = jnp.where(mask == 0, -1.0e9, scores)
    last_idx = lengths - 1
    last_item = hidden_states[jnp.arange(B), last_idx]
    attn = jax.nn.softmax(scores, axis=-1)
    sess = jnp.sum(hidden_states * attn[..., None], axis=1)
    w = jax.nn.sigmoid(params["last_item_weight"])[0]
    return w * last_item + (1 - w) * sess, attn


def _make_problem(key, B, S, E, H):
    k_x, k_pos, k_w1, k_b1, k_w2, k_len = jax.random.split(key, 6)
    params = {
        "pos_table": jax.random.normal(k_pos, (100, E), jnp.float32) * 0.02,
        "w1": jax.random.normal(k_w1, (H, E), jnp.float32) * (1.0 / jnp.sqrt(E)),
        "b1": jax.random.normal(k_b1, (H,), jnp.float32) * 0.01,
        "w2": jax.random.normal(k_w2, (1, H), jnp.float32) * (1.0 / jnp.sqrt(H)),
        "last_item_weight": jnp.ones((1,), jnp.float32),
    }
    hidden_states = jax.random.normal(k_x, (B, S, E), jnp.float32)
    lengths = jax.random.randint(k_len, (B,), 1, S + 1).astype(jnp.int32)
    mask = (jnp.arange(S)[None, :] < lengths[:, None]).astype(jnp.float32)
    return params, hidden_states, lengths, mask


if __name__ == "__main__":
    # ---- 1) small single-tile problem, explicit mask, f32 --------------------
    B, S, E, H = 2, 8, 32, 32
    params, hidden_states, _, _ = _make_problem(jax.random.PRNGKey(0), B, S, E, H)
    lengths = jnp.array([5, 8], dtype=jnp.int32)
    mask = (jnp.arange(S)[None, :] < lengths[:, None]).astype(jnp.float32)

    sess, attn = session_readout(hidden_states, lengths, params, mask)
    jax.block_until_ready((sess, attn))
    sess_r, attn_r = session_readout_ref(hidden_states, lengths, params, mask)
    assert sess.shape == (B, E) and attn.shape == (B, S)
    assert jnp.allclose(sess, sess_r, rtol=1e-3, atol=1e-5), "session_repr mismatch (f32)"
    assert jnp.allclose(attn, attn_r, rtol=1e-3, atol=1e-5), "attn_weights mismatch (f32)"

    # ---- 2) multi-tile grid, in-kernel length mask (no mask HBM stream) ------
    B2, S2, E2, H2 = 24, 16, 64, 64
    params2, x2, len2, mask2 = _make_problem(jax.random.PRNGKey(1), B2, S2, E2, H2)
    sess2_r, attn2_r = session_readout_ref(x2, len2, params2, mask2)

    sess2, attn2 = session_readout(x2, len2, params2, mask=None,
                                   mask_mode="lengths", batch_tile=8)
    jax.block_until_ready((sess2, attn2))
    assert jnp.allclose(sess2, sess2_r, rtol=1e-3, atol=1e-5), "session_repr mismatch (length mask)"
    assert jnp.allclose(attn2, attn2_r, rtol=1e-3, atol=1e-5), "attn_weights mismatch (length mask)"

    # ---- 3) auto batch tiling (>= 2 grid steps when B >= 16), explicit mask --
    sess3, attn3 = session_readout(x2, len2, params2, mask2)
    jax.block_until_ready((sess3, attn3))
    assert jnp.allclose(sess3, sess2_r, rtol=1e-3, atol=1e-5), "session_repr mismatch (auto tile)"
    assert jnp.allclose(attn3, attn2_r, rtol=1e-3, atol=1e-5), "attn_weights mismatch (auto tile)"

    # ---- 4) bf16 compute + bf16 hidden path (v6e / v7x) ----------------------
    sess4, attn4 = session_readout(x2, len2, params2, mask2,
                                   compute_dtype=jnp.bfloat16, batch_tile=8)
    jax.block_until_ready((sess4, attn4))
    assert jnp.allclose(sess4, sess2_r, rtol=1e-1, atol=1e-1), "session_repr mismatch (bf16)"
    assert jnp.allclose(attn4, attn2_r, rtol=1e-1, atol=1e-1), "attn_weights mismatch (bf16)"

    print("KERNEL_OK")
</pallas_src>

<mosaic_0001>
module attributes {stable_mosaic.version = 11 : i64} {
  func.func @_session_readout_kernel(%arg0: i32, %arg1: memref<1x1xf32, #tpu.memory_space<smem>>, %arg2: memref<2x8x32xf32, #tpu.memory_space<vmem>>, %arg3: memref<8x32xf32, #tpu.memory_space<vmem>>, %arg4: memref<32x128xf32, #tpu.memory_space<vmem>>, %arg5: memref<1x128xf32, #tpu.memory_space<vmem>>, %arg6: memref<1x128xf32, #tpu.memory_space<vmem>>, %arg7: memref<2x1xi32, #tpu.memory_space<vmem>>, %arg8: memref<2x8xf32, #tpu.memory_space<vmem>>, %arg9: memref<2x128xf32, #tpu.memory_space<vmem>>, %arg10: memref<2x128xf32, #tpu.memory_space<vmem>>) attributes {dimension_semantics = [#tpu.dimension_semantics<parallel>], iteration_bounds = array<i64: 1>, scalar_prefetch = 0 : i64, scratch_operands = 0 : i64, tpu.core_type = #tpu.core_type<tc>, window_params = [{transform_indices = @transform_0, window_bounds = array<i64: 1, 1>}, {transform_indices = @transform_1, window_bounds = array<i64: 2, 8, 32>}, {pipeline_mode = #tpu.pipeline_mode<synchronous>, transform_indices = @transform_2, window_bounds = array<i64: 8, 32>}, {pipeline_mode = #tpu.pipeline_mode<synchronous>, transform_indices = @transform_3, window_bounds = array<i64: 32, 128>}, {pipeline_mode = #tpu.pipeline_mode<synchronous>, transform_indices = @transform_4, window_bounds = array<i64: 1, 128>}, {pipeline_mode = #tpu.pipeline_mode<synchronous>, transform_indices = @transform_5, window_bounds = array<i64: 1, 128>}, {transform_indices = @transform_6, window_bounds = array<i64: 2, 1>}, {transform_indices = @transform_7, window_bounds = array<i64: 2, 8>}, {transform_indices = @transform_8, window_bounds = array<i64: 2, 128>}, {transform_indices = @transform_9, window_bounds = array<i64: 2, 128>}]} {
    %c0 = arith.constant 0 : index
    %c0_0 = arith.constant 0 : index
    %0 = vector.load %arg6[%c0, %c0_0] : memref<1x128xf32, #tpu.memory_space<vmem>>, vector<1x128xf32>
    %c0_1 = arith.constant 0 : index
    %c0_2 = arith.constant 0 : index
    %c0_3 = arith.constant 0 : index
    %1 = vector.load %arg2[%c0_1, %c0_2, %c0_3] : memref<2x8x32xf32, #tpu.memory_space<vmem>>, vector<2x8x32xf32>
    %c0_4 = arith.constant 0 : index
    %c0_5 = arith.constant 0 : index
    %2 = vector.load %arg3[%c0_4, %c0_5] : memref<8x32xf32, #tpu.memory_space<vmem>>, vector<8x32xf32>
    %3 = vector.shape_cast %2 : vector<8x32xf32> to vector<1x8x32xf32>
    %4 = vector.broadcast %3 : vector<1x8x32xf32> to vector<2x8x32xf32>
    %5 = arith.addf %1, %4 : vector<2x8x32xf32>
    %6 = vector.shape_cast %5 : vector<2x8x32xf32> to vector<16x32xf32>
    %c0_6 = arith.constant 0 : index
    %c0_7 = arith.constant 0 : index
    %7 = vector.load %arg4[%c0_6, %c0_7] : memref<32x128xf32, #tpu.memory_space<vmem>>, vector<32x128xf32>
    %cst = arith.constant dense<0.000000e+00> : vector<16x128xf32>
    %8 = tpu.matmul %6, %7, %cst {dimension_numbers = #tpu.dot_dimension_numbers<[1], [0], [0], [1], [0, 0, 1, 1], [], []>} : vector<16x32xf32>, vector<32x128xf32>, vector<16x128xf32> -> vector<16x128xf32>
    %c0_8 = arith.constant 0 : index
    %c0_9 = arith.constant 0 : index
    %9 = vector.load %arg5[%c0_8, %c0_9] : memref<1x128xf32, #tpu.memory_space<vmem>>, vector<1x128xf32>
    %10 = vector.broadcast %9 : vector<1x128xf32> to vector<16x128xf32>
    %11 = arith.addf %8, %10 : vector<16x128xf32>
    %12 = math.tanh %11 : vector<16x128xf32>
    %13 = vector.shape_cast %12 : vector<16x128xf32> to vector<2x8x128xf32>
    %14 = vector.shape_cast %0 : vector<1x128xf32> to vector<1x1x128xf32>
    %15 = vector.broadcast %14 : vector<1x1x128xf32> to vector<2x8x128xf32>
    %16 = arith.mulf %13, %15 : vector<2x8x128xf32>
    %cst_10 = arith.constant dense<0.000000e+00> : vector<2x8xf32>
    %17 = vector.multi_reduction <add>, %16, %cst_10 [2] : vector<2x8x128xf32> to vector<2x8xf32>
    %18 = tpu.iota {dimensions = array<i32: 1>} : vector<2x8xi32>
    %c0_11 = arith.constant 0 : index
    %c0_12 = arith.constant 0 : index
    %19 = vector.load %arg8[%c0_11, %c0_12] : memref<2x8xf32, #tpu.memory_space<vmem>>, vector<2x8xf32>
    %cst_13 = arith.constant 0.000000e+00 : f32
    %20 = vector.broadcast %cst_13 : f32 to vector<2x8xf32>
    %21 = arith.cmpf oeq, %19, %20 : vector<2x8xf32>
    %cst_14 = arith.constant -1.000000e+09 : f32
    %22 = vector.broadcast %cst_14 : f32 to vector<2x8xf32>
    %23 = arith.select %21, %22, %17 : vector<2x8xi1>, vector<2x8xf32>
    %cst_15 = arith.constant dense<0xFF800000> : vector<2xf32>
    %24 = vector.multi_reduction <maximumf>, %23, %cst_15 [1] : vector<2x8xf32> to vector<2xf32>
    %25 = vector.shape_cast %24 : vector<2xf32> to vector<2x1xf32>
    %26 = vector.broadcast %25 : vector<2x1xf32> to vector<2x8xf32>
    %27 = arith.subf %23, %26 : vector<2x8xf32>
    %28 = math.exp %27 : vector<2x8xf32>
    %cst_16 = arith.constant dense<0.000000e+00> : vector<2xf32>
    %29 = vector.multi_reduction <add>, %28, %cst_16 [1] : vector<2x8xf32> to vector<2xf32>
    %30 = vector.shape_cast %29 : vector<2xf32> to vector<2x1xf32>
    %31 = vector.broadcast %30 : vector<2x1xf32> to vector<2x8xf32>
    %32 = arith.divf %28, %31 : vector<2x8xf32>
    %c0_17 = arith.constant 0 : index
    %c0_18 = arith.constant 0 : index
    %33 = memref.load %arg1[%c0_17, %c0_18] : memref<1x1xf32, #tpu.memory_space<smem>>
    %c0_19 = arith.constant 0 : index
    %c0_20 = arith.constant 0 : index
    %34 = vector.load %arg7[%c0_19, %c0_20] : memref<2x1xi32, #tpu.memory_space<vmem>>, vector<2x1xi32>
    %c1_i32 = arith.constant 1 : i32
    %35 = vector.broadcast %c1_i32 : i32 to vector<2x1xi32>
    %36 = arith.subi %34, %35 : vector<2x1xi32>
    %c0_i32 = arith.constant 0 : i32
    %37 = vector.broadcast %c0_i32 : i32 to vector<2x1xi32>
    %38 = arith.cmpi slt, %36, %37 : vector<2x1xi32>
    %c8_i32 = arith.constant 8 : i32
    %39 = vector.broadcast %c8_i32 : i32 to vector<2x1xi32>
    %40 = arith.addi %36, %39 : vector<2x1xi32>
    %41 = arith.select %38, %40, %36 : vector<2x1xi1>, vector<2x1xi32>
    %42 = vector.broadcast %41 : vector<2x1xi32> to vector<2x8xi32>
    %43 = arith.cmpi eq, %18, %42 : vector<2x8xi32>
    %44 = arith.extui %43 : vector<2x8xi1> to vector<2x8xi32>
    %45 = arith.sitofp %44 : vector<2x8xi32> to vector<2x8xf32>
    %cst_21 = arith.constant 1.000000e+00 : f32
    %46 = arith.subf %cst_21, %33 : f32
    %47 = vector.broadcast %46 : f32 to vector<2x8xf32>
    %48 = arith.mulf %47, %32 : vector<2x8xf32>
    %49 = vector.broadcast %33 : f32 to vector<2x8xf32>
    %50 = arith.mulf %49, %45 : vector<2x8xf32>
    %51 = arith.addf %48, %50 : vector<2x8xf32>
    %c0_22 = arith.constant 0 : index
    %c0_23 = arith.constant 0 : index
    %c0_24 = arith.constant 0 : index
    %52 = vector.load %arg2[%c0_22, %c0_23, %c0_24] : memref<2x8x32xf32, #tpu.memory_space<vmem>>, vector<2x8x32xf32>
    %53 = vector.shape_cast %51 : vector<2x8xf32> to vector<2x8x1xf32>
    %54 = vector.broadcast %53 : vector<2x8x1xf32> to vector<2x8x32xf32>
    %55 = arith.mulf %52, %54 : vector<2x8x32xf32>
    %cst_25 = arith.constant dense<0.000000e+00> : vector<2x32xf32>
    %56 = vector.multi_reduction <add>, %55, %cst_25 [1] : vector<2x8x32xf32> to vector<2x32xf32>
    %cst_26 = arith.constant 0.000000e+00 : f32
    %57 = vector.broadcast %cst_26 : f32 to vector<2x120xf32>
    %58 = tpu.concatenate %32, %57 in 1 : vector<2x8xf32>, vector<2x120xf32> -> vector<2x128xf32>
    %c0_27 = arith.constant 0 : index
    %c0_28 = arith.constant 0 : index
    %59 = vector.load %arg10[%c0_27, %c0_28] : memref<2x128xf32, #tpu.memory_space<vmem>>, vector<2x128xf32>
    tpu.vector_store %arg10[%c0_27, %c0_28], %58 {strides = array<i32>} : memref<2x128xf32, #tpu.memory_space<vmem>>, vector<2x128xf32>,
    %cst_29 = arith.constant 0.000000e+00 : f32
    %60 = vector.broadcast %cst_29 : f32 to vector<2x96xf32>
    %61 = tpu.concatenate %56, %60 in 1 : vector<2x32xf32>, vector<2x96xf32> -> vector<2x128xf32>
    %c0_30 = arith.constant 0 : index
    %c0_31 = arith.constant 0 : index
    %62 = vector.load %arg9[%c0_30, %c0_31] : memref<2x128xf32, #tpu.memory_space<vmem>>, vector<2x128xf32>
    tpu.vector_store %arg9[%c0_30, %c0_31], %61 {strides = array<i32>} : memref<2x128xf32, #tpu.memory_space<vmem>>, vector<2x128xf32>,
    return
  }
  func.func @transform_0(%arg0: i32) -> (i32, i32) {
    %c0_i32 = arith.constant 0 : i32
    %c0_i32_0 = arith.constant 0 : i32
    %c0_i32_1 = arith.constant 0 : i32
    return %c0_i32, %c0_i32_0 : i32, i32
  }
  func.func @transform_1(%arg0: i32) -> (i32, i32, i32) {
    %c0_i32 = arith.constant 0 : i32
    %c0_i32_0 = arith.constant 0 : i32
    %c0_i32_1 = arith.constant 0 : i32
    return %arg0, %c0_i32, %c0_i32_0 : i32, i32, i32
  }
  func.func @transform_2(%arg0: i32) -> (i32, i32) {
    %c0_i32 = arith.constant 0 : i32
    %c0_i32_0 = arith.constant 0 : i32
    %c0_i32_1 = arith.constant 0 : i32
    return %c0_i32, %c0_i32_0 : i32, i32
  }
  func.func @transform_3(%arg0: i32) -> (i32, i32) {
    %c0_i32 = arith.constant 0 : i32
    %c0_i32_0 = arith.constant 0 : i32
    %c0_i32_1 = arith.constant 0 : i32
    return %c0_i32, %c0_i32_0 : i32, i32
  }
  func.func @transform_4(%arg0: i32) -> (i32, i32) {
    %c0_i32 = arith.constant 0 : i32
    %c0_i32_0 = arith.constant 0 : i32
    %c0_i32_1 = arith.constant 0 : i32
    return %c0_i32, %c0_i32_0 : i32, i32
  }
  func.func @transform_5(%arg0: i32) -> (i32, i32) {
    %c0_i32 = arith.constant 0 : i32
    %c0_i32_0 = arith.constant 0 : i32
    %c0_i32_1 = arith.constant 0 : i32
    return %c0_i32, %c0_i32_0 : i32, i32
  }
  func.func @transform_6(%arg0: i32) -> (i32, i32) {
    %c0_i32 = arith.constant 0 : i32
    %c0_i32_0 = arith.constant 0 : i32
    return %arg0, %c0_i32 : i32, i32
  }
  func.func @transform_7(%arg0: i32) -> (i32, i32) {
    %c0_i32 = arith.constant 0 : i32
    %c0_i32_0 = arith.constant 0 : i32
    return %arg0, %c0_i32 : i32, i32
  }
  func.func @transform_8(%arg0: i32) -> (i32, i32) {
    %c0_i32 = arith.constant 0 : i32
    %c0_i32_0 = arith.constant 0 : i32
    return %arg0, %c0_i32 : i32, i32
  }
  func.func @transform_9(%arg0: i32) -> (i32, i32) {
    %c0_i32 = arith.constant 0 : i32
    %c0_i32_0 = arith.constant 0 : i32
    return %arg0, %c0_i32 : i32, i32
  }
}

module attributes {stable_mosaic.version = 11 : i64} {
  func.func @_session_readout_kernel(%arg0: i32, %arg1: memref<1x1xf32, #tpu.memory_space<smem>>, %arg2: memref<2x8x32xf32, #tpu.memory_space<vmem>>, %arg3: memref<8x32xf32, #tpu.memory_space<vmem>>, %arg4: memref<32x128xf32, #tpu.memory_space<vmem>>, %arg5: memref<1x128xf32, #tpu.memory_space<vmem>>, %arg6: memref<1x128xf32, #tpu.memory_space<vmem>>, %arg7: memref<2x1xi32, #tpu.memory_space<vmem>>, %arg8: memref<2x8xf32, #tpu.memory_space<vmem>>, %arg9: memref<2x128xf32, #tpu.memory_space<vmem>>, %arg10: memref<2x128xf32, #tpu.memory_space<vmem>>) attributes {dimension_semantics = [#tpu.dimension_semantics<parallel>], iteration_bounds = array<i64: 1>, scalar_prefetch = 0 : i64, scratch_operands = 0 : i64, tpu.core_type = #tpu.core_type<tc>, window_params = [{transform_indices = @transform_0, window_bounds = array<i64: 1, 1>}, {transform_indices = @transform_1, window_bounds = array<i64: 2, 8, 32>}, {pipeline_mode = #tpu.pipeline_mode<synchronous>, transform_indices = @transform_2, window_bounds = array<i64: 8, 32>}, {pipeline_mode = #tpu.pipeline_mode<synchronous>, transform_indices = @transform_3, window_bounds = array<i64: 32, 128>}, {pipeline_mode = #tpu.pipeline_mode<synchronous>, transform_indices = @transform_4, window_bounds = array<i64: 1, 128>}, {pipeline_mode = #tpu.pipeline_mode<synchronous>, transform_indices = @transform_5, window_bounds = array<i64: 1, 128>}, {transform_indices = @transform_6, window_bounds = array<i64: 2, 1>}, {transform_indices = @transform_7, window_bounds = array<i64: 2, 8>}, {transform_indices = @transform_8, window_bounds = array<i64: 2, 128>}, {transform_indices = @transform_9, window_bounds = array<i64: 2, 128>}]} {
    %c0 = arith.constant 0 : index
    %c0_0 = arith.constant 0 : index
    %0 = vector.load %arg6[%c0, %c0_0] : memref<1x128xf32, #tpu.memory_space<vmem>>, vector<1x128xf32>
    %c0_1 = arith.constant 0 : index
    %c0_2 = arith.constant 0 : index
    %c0_3 = arith.constant 0 : index
    %1 = vector.load %arg2[%c0_1, %c0_2, %c0_3] : memref<2x8x32xf32, #tpu.memory_space<vmem>>, vector<2x8x32xf32>
    %c0_4 = arith.constant 0 : index
    %c0_5 = arith.constant 0 : index
    %2 = vector.load %arg3[%c0_4, %c0_5] : memref<8x32xf32, #tpu.memory_space<vmem>>, vector<8x32xf32>
    %3 = vector.shape_cast %2 : vector<8x32xf32> to vector<1x8x32xf32>
    %4 = vector.broadcast %3 : vector<1x8x32xf32> to vector<2x8x32xf32>
    %5 = arith.addf %1, %4 : vector<2x8x32xf32>
    %6 = vector.shape_cast %5 : vector<2x8x32xf32> to vector<16x32xf32>
    %c0_6 = arith.constant 0 : index
    %c0_7 = arith.constant 0 : index
    %7 = vector.load %arg4[%c0_6, %c0_7] : memref<32x128xf32, #tpu.memory_space<vmem>>, vector<32x128xf32>
    %cst = arith.constant dense<0.000000e+00> : vector<16x128xf32>
    %8 = tpu.matmul %6, %7, %cst {dimension_numbers = #tpu.dot_dimension_numbers<[1], [0], [0], [1], [0, 0, 1, 1], [], []>} : vector<16x32xf32>, vector<32x128xf32>, vector<16x128xf32> -> vector<16x128xf32>
    %c0_8 = arith.constant 0 : index
    %c0_9 = arith.constant 0 : index
    %9 = vector.load %arg5[%c0_8, %c0_9] : memref<1x128xf32, #tpu.memory_space<vmem>>, vector<1x128xf32>
    %10 = vector.broadcast %9 : vector<1x128xf32> to vector<16x128xf32>
    %11 = arith.addf %8, %10 : vector<16x128xf32>
    %12 = math.tanh %11 : vector<16x128xf32>
    %13 = vector.shape_cast %12 : vector<16x128xf32> to vector<2x8x128xf32>
    %14 = vector.shape_cast %0 : vector<1x128xf32> to vector<1x1x128xf32>
    %15 = vector.broadcast %14 : vector<1x1x128xf32> to vector<2x8x128xf32>
    %16 = arith.mulf %13, %15 : vector<2x8x128xf32>
    %cst_10 = arith.constant dense<0.000000e+00> : vector<2x8xf32>
    %17 = vector.multi_reduction <add>, %16, %cst_10 [2] : vector<2x8x128xf32> to vector<2x8xf32>
    %18 = tpu.iota {dimensions = array<i32: 1>} : vector<2x8xi32>
    %c0_11 = arith.constant 0 : index
    %c0_12 = arith.constant 0 : index
    %19 = vector.load %arg8[%c0_11, %c0_12] : memref<2x8xf32, #tpu.memory_space<vmem>>, vector<2x8xf32>
    %cst_13 = arith.constant 0.000000e+00 : f32
    %20 = vector.broadcast %cst_13 : f32 to vector<2x8xf32>
    %21 = arith.cmpf oeq, %19, %20 : vector<2x8xf32>
    %cst_14 = arith.constant -1.000000e+09 : f32
    %22 = vector.broadcast %cst_14 : f32 to vector<2x8xf32>
    %23 = arith.select %21, %22, %17 : vector<2x8xi1>, vector<2x8xf32>
    %cst_15 = arith.constant dense<0xFF800000> : vector<2xf32>
    %24 = vector.multi_reduction <maximumf>, %23, %cst_15 [1] : vector<2x8xf32> to vector<2xf32>
    %25 = vector.shape_cast %24 : vector<2xf32> to vector<2x1xf32>
    %26 = vector.broadcast %25 : vector<2x1xf32> to vector<2x8xf32>
    %27 = arith.subf %23, %26 : vector<2x8xf32>
    %28 = math.exp %27 : vector<2x8xf32>
    %cst_16 = arith.constant dense<0.000000e+00> : vector<2xf32>
    %29 = vector.multi_reduction <add>, %28, %cst_16 [1] : vector<2x8xf32> to vector<2xf32>
    %30 = vector.shape_cast %29 : vector<2xf32> to vector<2x1xf32>
    %31 = vector.broadcast %30 : vector<2x1xf32> to vector<2x8xf32>
    %32 = arith.divf %28, %31 : vector<2x8xf32>
    %c0_17 = arith.constant 0 : index
    %c0_18 = arith.constant 0 : index
    %33 = memref.load %arg1[%c0_17, %c0_18] : memref<1x1xf32, #tpu.memory_space<smem>>
    %c0_19 = arith.constant 0 : index
    %c0_20 = arith.constant 0 : index
    %34 = vector.load %arg7[%c0_19, %c0_20] : memref<2x1xi32, #tpu.memory_space<vmem>>, vector<2x1xi32>
    %c1_i32 = arith.constant 1 : i32
    %35 = vector.broadcast %c1_i32 : i32 to vector<2x1xi32>
    %36 = arith.subi %34, %35 : vector<2x1xi32>
    %c0_i32 = arith.constant 0 : i32
    %37 = vector.broadcast %c0_i32 : i32 to vector<2x1xi32>
    %38 = arith.cmpi slt, %36, %37 : vector<2x1xi32>
    %c8_i32 = arith.constant 8 : i32
    %39 = vector.broadcast %c8_i32 : i32 to vector<2x1xi32>
    %40 = arith.addi %36, %39 : vector<2x1xi32>
    %41 = arith.select %38, %40, %36 : vector<2x1xi1>, vector<2x1xi32>
    %42 = vector.broadcast %41 : vector<2x1xi32> to vector<2x8xi32>
    %43 = arith.cmpi eq, %18, %42 : vector<2x8xi32>
    %44 = arith.extui %43 : vector<2x8xi1> to vector<2x8xi32>
    %45 = arith.sitofp %44 : vector<2x8xi32> to vector<2x8xf32>
    %cst_21 = arith.constant 1.000000e+00 : f32
    %46 = arith.subf %cst_21, %33 : f32
    %47 = vector.broadcast %46 : f32 to vector<2x8xf32>
    %48 = arith.mulf %47, %32 : vector<2x8xf32>
    %49 = vector.broadcast %33 : f32 to vector<2x8xf32>
    %50 = arith.mulf %49, %45 : vector<2x8xf32>
    %51 = arith.addf %48, %50 : vector<2x8xf32>
    %c0_22 = arith.constant 0 : index
    %c0_23 = arith.constant 0 : index
    %c0_24 = arith.constant 0 : index
    %52 = vector.load %arg2[%c0_22, %c0_23, %c0_24] : memref<2x8x32xf32, #tpu.memory_space<vmem>>, vector<2x8x32xf32>
    %53 = vector.shape_cast %51 : vector<2x8xf32> to vector<2x8x1xf32>
    %54 = vector.broadcast %53 : vector<2x8x1xf32> to vector<2x8x32xf32>
    %55 = arith.mulf %52, %54 : vector<2x8x32xf32>
    %cst_25 = arith.constant dense<0.000000e+00> : vector<2x32xf32>
    %56 = vector.multi_reduction <add>, %55, %cst_25 [1] : vector<2x8x32xf32> to vector<2x32xf32>
    %cst_26 = arith.constant 0.000000e+00 : f32
    %57 = vector.broadcast %cst_26 : f32 to vector<2x120xf32>
    %58 = tpu.concatenate %32, %57 in 1 : vector<2x8xf32>, vector<2x120xf32> -> vector<2x128xf32>
    %c0_27 = arith.constant 0 : index
    %c0_28 = arith.constant 0 : index
    %59 = vector.load %arg10[%c0_27, %c0_28] : memref<2x128xf32, #tpu.memory_space<vmem>>, vector<2x128xf32>
    tpu.vector_store %arg10[%c0_27, %c0_28], %58 {strides = array<i32>} : memref<2x128xf32, #tpu.memory_space<vmem>>, vector<2x128xf32>,
    %cst_29 = arith.constant 0.000000e+00 : f32
    %60 = vector.broadcast %cst_29 : f32 to vector<2x96xf32>
    %61 = tpu.concatenate %56, %60 in 1 : vector<2x32xf32>, vector<2x96xf32> -> vector<2x128xf32>
    %c0_30 = arith.constant 0 : index
    %c0_31 = arith.constant 0 : index
    %62 = vector.load %arg9[%c0_30, %c0_31] : memref<2x128xf32, #tpu.memory_space<vmem>>, vector<2x128xf32>
    tpu.vector_store %arg9[%c0_30, %c0_31], %61 {strides = array<i32>} : memref<2x128xf32, #tpu.memory_space<vmem>>, vector<2x128xf32>,
    return
  }
  func.func @transform_0(%arg0: i32) -> (i32, i32) {
    %c0_i32 = arith.constant 0 : i32
    %c0_i32_0 = arith.constant 0 : i32
    %c0_i32_1 = arith.constant 0 : i32
    return %c0_i32, %c0_i32_0 : i32, i32
  }
  func.func @transform_1(%arg0: i32) -> (i32, i32, i32) {
    %c0_i32 = arith.constant 0 : i32
    %c0_i32_0 = arith.constant 0 : i32
    %c0_i32_1 = arith.constant 0 : i32
    return %arg0, %c0_i32, %c0_i32_0 : i32, i32, i32
  }
  func.func @transform_2(%arg0: i32) -> (i32, i32) {
    %c0_i32 = arith.constant 0 : i32
    %c0_i32_0 = arith.constant 0 : i32
    %c0_i32_1 = arith.constant 0 : i32
    return %c0_i32, %c0_i32_0 : i32, i32
  }
  func.func @transform_3(%arg0: i32) -> (i32, i32) {
    %c0_i32 = arith.constant 0 : i32
    %c0_i32_0 = arith.constant 0 : i32
    %c0_i32_1 = arith.constant 0 : i32
    return %c0_i32, %c0_i32_0 : i32, i32
  }
  func.func @transform_4(%arg0: i32) -> (i32, i32) {
    %c0_i32 = arith.constant 0 : i32
    %c0_i32_0 = arith.constant 0 : i32
    %c0_i32_1 = arith.constant 0 : i32
    return %c0_i32, %c0_i32_0 : i32, i32
  }
  func.func @transform_5(%arg0: i32) -> (i32, i32) {
    %c0_i32 = arith.constant 0 : i32
    %c0_i32_0 = arith.constant 0 : i32
    %c0_i32_1 = arith.constant 0 : i32
    return %c0_i32, %c0_i32_0 : i32, i32
  }
  func.func @transform_6(%arg0: i32) -> (i32, i32) {
    %c0_i32 = arith.constant 0 : i32
    %c0_i32_0 = arith.constant 0 : i32
    return %arg0, %c0_i32 : i32, i32
  }
  func.func @transform_7(%arg0: i32) -> (i32, i32) {
    %c0_i32 = arith.constant 0 : i32
    %c0_i32_0 = arith.constant 0 : i32
    return %arg0, %c0_i32 : i32, i32
  }
  func.func @transform_8(%arg0: i32) -> (i32, i32) {
    %c0_i32 = arith.constant 0 : i32
    %c0_i32_0 = arith.constant 0 : i32
    return %arg0, %c0_i32 : i32, i32
  }
  func.func @transform_9(%arg0: i32) -> (i32, i32) {
    %c0_i32 = arith.constant 0 : i32
    %c0_i32_0 = arith.constant 0 : i32
    return %arg0, %c0_i32 : i32, i32
  }
}

</mosaic_0001>

<bundles_post_ra>
// kernel: tpu_custom_call.1
= control target key start
LH: loop header
LB: loop body
LE: loop exit
PB: predicated region body
PF: predicated region fallthrough
CT: control target
= control target key end

     0   :  { %16 = vsyncpa [#allocation4], 0  ;;  %s529_s0 = inlined_call_operand.<no memory space> [shape: f32[1,1], index: 0, kind: input, shape index: {}]   ;;  %s530_s1 = inlined_call_operand.hbm [shape: f32[2,8,32], index: 1, kind: input, shape index: {}]   ;;  %s531_s2 = inlined_call_operand.hbm [shape: f32[8,32], index: 2, kind: input, shape index: {}]   ;;  %s532_s3 = inlined_call_operand.hbm [shape: f32[32,128], index: 3, kind: input, shape index: {}]   ;;  %s533_s4 = inlined_call_operand.vmem [shape: f32[1,128], index: 4, kind: input, shape index: {}]   ;;  %s534_s5 = inlined_call_operand.vmem [shape: f32[1,128], index: 5, kind: input, shape index: {}]   ;;  %s535_s6 = inlined_call_operand.vmem [shape: s32[2,1], index: 6, kind: input, shape index: {}]   ;;  %s536_s7 = inlined_call_operand.vmem [shape: f32[2,8], index: 7, kind: input, shape index: {}]   ;;  %s537_s8 = inlined_call_operand.hbm [shape: f32[2,128], index: 8, kind: output, shape index: {0}]   ;;  %s538_s9 = inlined_call_operand.hbm [shape: f32[2,128], index: 9, kind: output, shape index: {1}]  }
   0x1   :  { %17 = vsyncpa [#allocation7], 0 }
   0x2   :  { %18 = vsyncpa [#allocation5], 0  ;;  %s40_s11 = sshll.u32 %s531_s2, 4  ;;  %s41_s11 = int_to_ptr.hbm [resolvable:$true] %s40_s11 }
   0x3   :  { %19 = vsyncpa [#allocation11], 0  ;;  %s420_s12 = smov [#allocation6]   ;;  %s26_s16 = sshll.u32 %s530_s1, 4  ;;  %s27_s16 = int_to_ptr.hbm [resolvable:$true] %s26_s16 }
   0x4   :  { %s42_s13 = sshll.u32 %s420_s12, 4  ;;  %s421_s17 = smov [#allocation3]   ;;  %s43_s13 = int_to_ptr.vmem [resolvable:$true] %s42_s13 }
   0x5   :  { %45 = dma.hbm_to_vmem [thread:$0]  %s41_s11, 128, %s43_s13, [#allocation7]  }
   0x6   :  { %s28_s18 = sshll.u32 %s421_s17, 4  ;;  %s422_s19 = smov 128   ;;  %s29_s18 = int_to_ptr.vmem [resolvable:$true] %s28_s18 }
   0x7   :  { %s423_s20 = smov 8   ;;  %s50_s2 = sshll.u32 %s532_s3, 4  ;;  %s51_s2 = int_to_ptr.hbm [resolvable:$true] %s50_s2 }
   0x8   :  { %34 = dma.hbm_to_vmem [thread:$0]  %s27_s16, 256, %s29_s18, [#allocation4], %s422_s19, %s422_s19, %s423_s20  }
   0x9   :  { %s424_s23 = smov [#allocation8]  }
   0xa   :  { %s52_s24 = sshll.u32 %s424_s23, 4  ;;  %s53_s24 = int_to_ptr.vmem [resolvable:$true] %s52_s24 }
   0xb   :  { %58 = dma.hbm_to_vmem [thread:$0]  %s51_s2, 512, %s53_s24, [#allocation7], %s422_s19, %s422_s19, %s423_s20  }
   0xc   :  { %412 = dma.done.wait [#allocation4], 256  }
   0xd   :  { %413 = vsyncadd [#allocation4], 4294967040 }
   0xe   :  { %414 = dma.done.wait [#allocation7], 640  }
   0xf   :  { %415 = vsyncadd [#allocation7], 4294966656  ;;  %v88_v0 = vld [vmem:[#allocation8 + $0x18] sm:$0xff]  ;;  %v87_v1 = vld [vmem:[#allocation8 + $0x10] sm:$0xff]  ;;  %vm93_vm0 = vcmask 261120   ;;  %v134_v20 = vlaneseq  ;;  %vm142_vm1 = vcmask 1041409   ;;  %v186_v50 = vstv %s529_s0 }
  0x10   :  { %112 = vmatpush.msra.mxu0 %v88_v0  ;;  %v488_v2 = vld [vmem:[#allocation3] sm:$0xff]  ;;  %v82_v3 = vld [vmem:[#allocation6] sm:$0xff]  ;;  %266 = vmatpush.msra.mxu1 %v88_v0  ;;  %v490_v5 = vld [vmem:[#allocation3 + $0x8] sm:$0xff]  ;;  %vm146_vm3 = vcmask 58368   ;;  %v425_v30 = vmov 0   ;;  %s183_s29 = ssub.f32 1.0, %s529_s0 }
  0x11   :  { %v86_v4 = vld [vmem:[#allocation8 + $0x8] sm:$0xff]  ;;  %v85_v6 = vld [vmem:[#allocation8] sm:$0xff]  ;;  %v83_v7 = vadd.f32 %v82_v3, %v488_v2  ;;  %v84_v8 = vadd.f32 %v82_v3, %v490_v5  ;;  %v135_v21 = vand.u32 127, %v134_v20  ;;  %279 = vset.pattern.permute.xlu2 %v425_v30  ;;  %v191_v39 = vshrl.u32 %v134_v20, 7  ;;  %s427_s11 = smov [#allocation10]   ;;  %s246_s14 = sshll.u32 %s538_s9, 4  ;;  %s247_s14 = int_to_ptr.hbm [resolvable:$true] %s246_s14 }
  0x12   :  { %113 = vmatpush.msra.mxu0 %v87_v1  ;;  %267 = vmatpush.msra.mxu1 %v87_v1  ;;  %v282_v9 = vld [vmem:[%s533_s4] ss:$0 sm:$0xff]  ;;  %v426_v51 = vmov 0.0   ;;  %v184_v55 = vstv %s183_s29  ;;  %vm219_vm10 = vcmask 64512   ;;  %s244_s12 = sshll.u32 %s427_s11, 4  ;;  %s428_s9 = smov [#allocation9]   ;;  %s245_s12 = int_to_ptr.vmem [resolvable:$true] %s244_s12 }
  0x13   :  { %v283_v14 = vld [vmem:[%s534_s5] ss:$0 sm:$0xff]  ;;  %281 = vset.pattern.permute.xlu0 %v191_v39  ;;  %s233_s15 = sshll.u32 %s428_s9, 4  ;;  %s235_s18 = sshll.u32 %s537_s8, 4  ;;  %s234_s15 = int_to_ptr.vmem [resolvable:$true] %s233_s15  ;;  %s236_s18 = int_to_ptr.hbm [resolvable:$true] %s235_s18 }
  0x14   :  { %114 = vmatpush.msra.mxu0 %v86_v4  ;;  %268 = vmatpush.msra.mxu1 %v86_v4  ;;  %v136_v22 = vld [vmem:[%s536_s7] sm:$0x3] }
  0x15   :  { %vm137_vm2 = vcmp.eq.f32.partialorder %v136_v22, 0.0  ;;  %v172_v29 = vld [vmem:[%s535_s6] sm:$0x3] }
  0x16   :  { %115 = vmatpush.msra.mxu0 %v85_v6  ;;  %269 = vmatpush.msra.mxu1 %v85_v6  ;;  %v264_v31 = vadd.s32 4294967295, %v172_v29 }
  0x17   :  { %262 = vmatmul.msk.f32.vlgmr.msra.gmra.mxu0 %vm93_vm0, %v83_v7  ;;  %263 = vmatmul.msk.f32.vlgmr.msra.gmra.mxu1 %vm93_vm0, %v84_v8 }
  0x18   :  { %vm174_vm4 = vcmp.lt.s32.totalorder %v264_v31, 0  ;;  %v175_v32 = vadd.s32 8, %v264_v31 }
  0x1a   :  { %v176_v33 = vsel %vm174_vm4, %v175_v32, %v264_v31 }
  0x1b   :  { %178 = vperm.xlu2 %279, %v176_v33  }
  0x23   :  { %280 = vset.pattern.permute.xlu2 %v191_v39 }
  0x75   :  { %v179_v43 = vpop.permute.xlu2 %178 }
  0x76   :  { %vm180_vm6 = vcmp.eq.s32.totalorder %v135_v21, %v179_v43 }
  0x77   :  { %v265_v52 = vsel %vm180_vm6, 1.0, %v426_v51 }
  0x78   :  { %v187_v57 = vmul.f32 %v265_v52, %v186_v50 }
  0x94   :  { %v117_v10 = vpop.f32.mrf.mxu0  ;;  %v120_v11 = vpop.f32.mrf.mxu1 }
  0x95   :  { %v118_v12 = vadd.f32 %v282_v9, %v117_v10  ;;  %v121_v13 = vadd.f32 %v282_v9, %v120_v11 }
  0x97   :  { %284 = vtanh.f32 %v118_v12 }
  0x98   :  { %286 = vtanh.f32 %v121_v13 }
  0x9d   :  { %v285_v15 = vpop.eup %284 }
  0x9e   :  { %v128_v16 = vmul.f32 %v285_v15, %v283_v14  ;;  %v287_v17 = vpop.eup %286 }
  0x9f   :  { %v129_v18 = vmul.f32 %v287_v17, %v283_v14 }
  0xa0   :  { %130 = vadd.xlane.f32.xlu0 %v128_v16 }
  0xa8   :  { %132 = vadd.xlane.f32.xlu0 %v129_v18 }
 0x113   :  { %v131_v19 = vpop.xlane.xlu0 %130 }
 0x114   :  { %v140_v24 = vperm.slane %v131_v19, %v135_v21 }
 0x11b   :  { %v133_v23 = vpop.xlane.xlu0 %132 }
 0x11c   :  { %v141_v25 = vperm.slane %v133_v23, %v135_v21 }
 0x11e   :  { %v143_v26 = vsel %vm142_vm1, %v141_v25, %v140_v24 }
 0x11f   :  { %v145_v27 = vsel %vm137_vm2, -1e+09, %v143_v26 }
 0x120   :  { %v147_v28 = vsel %vm146_vm3, %v145_v27, -inf }
 0x121   :  { %148 = vmax.xlane.f32.xlu1 %v147_v28 }
 0x194   :  { %v149_v34 = vpop.xlane.xlu1 %148 }
 0x195   :  { %v150_v35 = vsub.f32 %v145_v27, %v149_v34 }
 0x197   :  { %v151_v36 = vmul.f32 1.442695, %v150_v35 }
 0x199   :  { %288 = vpow2.f32 %v151_v36 }
 0x19f   :  { %v289_v37 = vpop.eup %288 }
 0x1a0   :  { %v153_v38 = vsel %vm146_vm3, %v289_v37, 0.0 }
 0x1a1   :  { %154 = vadd.xlane.f32.xlu1 %v153_v38 }
 0x214   :  { %v155_v40 = vpop.xlane.xlu1 %154 }
 0x215   :  { %290 = vrcp.f32 %v155_v40  ;;  %v167_v45 = vand.u32 2147483648, %v155_v40  ;;  %v165_v47 = vand.u32 2147483647, %v155_v40  ;;  %vm161_vm7 = vweird.f32 %v155_v40 }
 0x217   :  { %v168_v49 = vor.u32 1.1754944e-38, %v167_v45  ;;  %vm166_vm9 = vcmp.eq.f32.partialorder %v165_v47, 8.507059e+37 }
 0x21b   :  { %v291_v41 = vpop.eup %290 }
 0x21c   :  { %v157_v42 = vmul.f32 %v291_v41, %v155_v40  ;;  %vm162_vm5 = vweird.f32 %v291_v41 }
 0x21d   :  { %vm163_vm8 = vmor %vm161_vm7, %vm162_vm5 }
 0x21e   :  { %v158_v44 = vsub.f32 1.0, %v157_v42 }
 0x220   :  { %v159_v46 = vmul.f32 %v291_v41, %v158_v44 }
 0x222   :  { %v160_v48 = vadd.f32 %v291_v41, %v159_v46 }
 0x224   :  { %v164_v53 = vsel %vm163_vm8, %v291_v41, %v160_v48 }
 0x225   :  { %v169_v54 = vsel %vm166_vm9, %v168_v49, %v164_v53 }
 0x226   :  { %v170_v56 = vmul.f32 %v289_v37, %v169_v54 }
 0x228   :  { %v185_v58 = vmul.f32 %v184_v55, %v170_v56  ;;  %v220_v59 = vsel %vm219_vm10, %v170_v56, 0.0 }
 0x229   :  { %221 = vst [vmem:[#allocation10] sm:$0x3] %v220_v59 }
 0x22a   :  { %v188_v60 = vadd.f32 %v187_v57, %v185_v58  ;;  %249 = dma.vmem_to_hbm [thread:$0]  %s245_s12, 32, %s247_s14, [#allocation11]  }
 0x22c   :  { %v196_v61 = vperm.slane %v188_v60, 1  ;;  %v189_v62 = vperm.slane %v188_v60, 0 }
 0x22e   :  { %201 = vperm.xlu0 %281, %v196_v61   ;;  %194 = vperm.xlu2 %280, %v189_v62  }
 0x288   :  { %v195_v63 = vpop.permute.xlu2 %194 }
 0x289   :  { %v203_v0 = vmul.f32 %v195_v63, %v488_v2 }
 0x28b   :  { %v205_v1 = vsel %vm93_vm0, %v203_v0, 0.0 }
 0x28c   :  { %v206_v3 = vrot.slane %v205_v1, 4 }
 0x28e   :  { %v207_v4 = vadd.f32 %v206_v3, %v205_v1 }
 0x290   :  { %v208_v8 = vrot.slane %v207_v4, 2 }
 0x292   :  { %v209_v11 = vadd.f32 %v208_v8, %v207_v4 }
 0x294   :  { %v210_v14 = vrot.slane %v209_v11, 1 }
 0x296   :  { %v211_v2 = vadd.f32 %v210_v14, %v209_v11 }
 0x2a0   :  { %v202_v6 = vpop.permute.xlu0 %201 }
 0x2a1   :  { %v204_v7 = vmul.f32 %v202_v6, %v490_v5 }
 0x2a3   :  { %v212_v9 = vsel %vm93_vm0, %v204_v7, 0.0 }
 0x2a4   :  { %v213_v10 = vrot.slane %v212_v9, 4 }
 0x2a6   :  { %v214_v12 = vadd.f32 %v213_v10, %v212_v9 }
 0x2a8   :  { %v215_v13 = vrot.slane %v214_v12, 2 }
 0x2aa   :  { %v216_v15 = vadd.f32 %v215_v13, %v214_v12 }
 0x2ac   :  { %v217_v16 = vrot.slane %v216_v15, 1 }
 0x2ae   :  { %v218_v17 = vadd.f32 %v217_v16, %v216_v15 }
 0x2b0   :  { %v224_v5 = vsel %vm142_vm1, %v218_v17, %v211_v2 }
 0x2b1   :  { %v226_v18 = vsel %vm93_vm0, %v224_v5, 0.0 }
 0x2b2   :  { %227 = vst [vmem:[#allocation9] sm:$0x3] %v226_v18 }
 0x2b3   :  { %238 = dma.vmem_to_hbm [thread:$0]  %s234_s15, 32, %s236_s18, [#allocation5]  }
 0x2b4   :  { %416 = dma.done.wait [#allocation5], 32  }
 0x2b5   :  { %417 = vsyncadd [#allocation5], 4294967264 }
 0x2b6   :  { %418 = dma.done.wait [#allocation11], 32  }
 0x2b7   :  { %419 = vsyncadd [#allocation11], 4294967264 }
 0x2b8   :  { %258 = vsyncpa [#allocation4], 1 }
 0x2b9   :  { %259 = vsyncpa [#allocation7], 1 }
 0x2ba   :  { %260 = vsyncpa [#allocation5], 1 }
 0x2bb   :  { %261 = vsyncpa [#allocation11], 1 }

// kernel: tpu_custom_call.1
= control target key start
LH: loop header
LB: loop body
LE: loop exit
PB: predicated region body
PF: predicated region fallthrough
CT: control target
= control target key end

     0   :  { %16 = vsyncpa [#allocation4], 0  ;;  %s529_s0 = inlined_call_operand.<no memory space> [shape: f32[1,1], index: 0, kind: input, shape index: {}]   ;;  %s530_s1 = inlined_call_operand.hbm [shape: f32[2,8,32], index: 1, kind: input, shape index: {}]   ;;  %s531_s2 = inlined_call_operand.hbm [shape: f32[8,32], index: 2, kind: input, shape index: {}]   ;;  %s532_s3 = inlined_call_operand.hbm [shape: f32[32,128], index: 3, kind: input, shape index: {}]   ;;  %s533_s4 = inlined_call_operand.vmem [shape: f32[1,128], index: 4, kind: input, shape index: {}]   ;;  %s534_s5 = inlined_call_operand.vmem [shape: f32[1,128], index: 5, kind: input, shape index: {}]   ;;  %s535_s6 = inlined_call_operand.vmem [shape: s32[2,1], index: 6, kind: input, shape index: {}]   ;;  %s536_s7 = inlined_call_operand.vmem [shape: f32[2,8], index: 7, kind: input, shape index: {}]   ;;  %s537_s8 = inlined_call_operand.hbm [shape: f32[2,128], index: 8, kind: output, shape index: {0}]   ;;  %s538_s9 = inlined_call_operand.hbm [shape: f32[2,128], index: 9, kind: output, shape index: {1}]  }
   0x1   :  { %17 = vsyncpa [#allocation7], 0 }
   0x2   :  { %18 = vsyncpa [#allocation5], 0  ;;  %s40_s11 = sshll.u32 %s531_s2, 4  ;;  %s41_s11 = int_to_ptr.hbm [resolvable:$true] %s40_s11 }
   0x3   :  { %19 = vsyncpa [#allocation11], 0  ;;  %s420_s12 = smov [#allocation6]   ;;  %s26_s16 = sshll.u32 %s530_s1, 4  ;;  %s27_s16 = int_to_ptr.hbm [resolvable:$true] %s26_s16 }
   0x4   :  { %s42_s13 = sshll.u32 %s420_s12, 4  ;;  %s421_s17 = smov [#allocation3]   ;;  %s43_s13 = int_to_ptr.vmem [resolvable:$true] %s42_s13 }
   0x5   :  { %45 = dma.hbm_to_vmem [thread:$0]  %s41_s11, 128, %s43_s13, [#allocation7]  }
   0x6   :  { %s28_s18 = sshll.u32 %s421_s17, 4  ;;  %s422_s19 = smov 128   ;;  %s29_s18 = int_to_ptr.vmem [resolvable:$true] %s28_s18 }
   0x7   :  { %s423_s20 = smov 8   ;;  %s50_s2 = sshll.u32 %s532_s3, 4  ;;  %s51_s2 = int_to_ptr.hbm [resolvable:$true] %s50_s2 }
   0x8   :  { %34 = dma.hbm_to_vmem [thread:$0]  %s27_s16, 256, %s29_s18, [#allocation4], %s422_s19, %s422_s19, %s423_s20  }
   0x9   :  { %s424_s23 = smov [#allocation8]  }
   0xa   :  { %s52_s24 = sshll.u32 %s424_s23, 4  ;;  %s53_s24 = int_to_ptr.vmem [resolvable:$true] %s52_s24 }
   0xb   :  { %58 = dma.hbm_to_vmem [thread:$0]  %s51_s2, 512, %s53_s24, [#allocation7], %s422_s19, %s422_s19, %s423_s20  }
   0xc   :  { %412 = dma.done.wait [#allocation4], 256  }
   0xd   :  { %413 = vsyncadd [#allocation4], 4294967040 }
   0xe   :  { %414 = dma.done.wait [#allocation7], 640  }
   0xf   :  { %415 = vsyncadd [#allocation7], 4294966656  ;;  %v88_v0 = vld [vmem:[#allocation8 + $0x18] sm:$0xff]  ;;  %v87_v1 = vld [vmem:[#allocation8 + $0x10] sm:$0xff]  ;;  %vm93_vm0 = vcmask 261120   ;;  %v134_v20 = vlaneseq  ;;  %vm142_vm1 = vcmask 1041409   ;;  %v186_v50 = vstv %s529_s0 }
  0x10   :  { %112 = vmatpush.msra.mxu0 %v88_v0  ;;  %v488_v2 = vld [vmem:[#allocation3] sm:$0xff]  ;;  %v82_v3 = vld [vmem:[#allocation6] sm:$0xff]  ;;  %266 = vmatpush.msra.mxu1 %v88_v0  ;;  %v490_v5 = vld [vmem:[#allocation3 + $0x8] sm:$0xff]  ;;  %vm146_vm3 = vcmask 58368   ;;  %v425_v30 = vmov 0   ;;  %s183_s29 = ssub.f32 1.0, %s529_s0 }
  0x11   :  { %v86_v4 = vld [vmem:[#allocation8 + $0x8] sm:$0xff]  ;;  %v85_v6 = vld [vmem:[#allocation8] sm:$0xff]  ;;  %v83_v7 = vadd.f32 %v82_v3, %v488_v2  ;;  %v84_v8 = vadd.f32 %v82_v3, %v490_v5  ;;  %v135_v21 = vand.u32 127, %v134_v20  ;;  %279 = vset.pattern.permute.xlu2 %v425_v30  ;;  %v191_v39 = vshrl.u32 %v134_v20, 7  ;;  %s427_s11 = smov [#allocation10]   ;;  %s246_s14 = sshll.u32 %s538_s9, 4  ;;  %s247_s14 = int_to_ptr.hbm [resolvable:$true] %s246_s14 }
  0x12   :  { %113 = vmatpush.msra.mxu0 %v87_v1  ;;  %267 = vmatpush.msra.mxu1 %v87_v1  ;;  %v282_v9 = vld [vmem:[%s533_s4] ss:$0 sm:$0xff]  ;;  %v426_v51 = vmov 0.0   ;;  %v184_v55 = vstv %s183_s29  ;;  %vm219_vm10 = vcmask 64512   ;;  %s244_s12 = sshll.u32 %s427_s11, 4  ;;  %s428_s9 = smov [#allocation9]   ;;  %s245_s12 = int_to_ptr.vmem [resolvable:$true] %s244_s12 }
  0x13   :  { %v283_v14 = vld [vmem:[%s534_s5] ss:$0 sm:$0xff]  ;;  %281 = vset.pattern.permute.xlu0 %v191_v39  ;;  %s233_s15 = sshll.u32 %s428_s9, 4  ;;  %s235_s18 = sshll.u32 %s537_s8, 4  ;;  %s234_s15 = int_to_ptr.vmem [resolvable:$true] %s233_s15  ;;  %s236_s18 = int_to_ptr.hbm [resolvable:$true] %s235_s18 }
  0x14   :  { %114 = vmatpush.msra.mxu0 %v86_v4  ;;  %268 = vmatpush.msra.mxu1 %v86_v4  ;;  %v136_v22 = vld [vmem:[%s536_s7] sm:$0x3] }
  0x15   :  { %vm137_vm2 = vcmp.eq.f32.partialorder %v136_v22, 0.0  ;;  %v172_v29 = vld [vmem:[%s535_s6] sm:$0x3] }
  0x16   :  { %115 = vmatpush.msra.mxu0 %v85_v6  ;;  %269 = vmatpush.msra.mxu1 %v85_v6  ;;  %v264_v31 = vadd.s32 4294967295, %v172_v29 }
  0x17   :  { %262 = vmatmul.msk.f32.vlgmr.msra.gmra.mxu0 %vm93_vm0, %v83_v7  ;;  %263 = vmatmul.msk.f32.vlgmr.msra.gmra.mxu1 %vm93_vm0, %v84_v8 }
  0x18   :  { %vm174_vm4 = vcmp.lt.s32.totalorder %v264_v31, 0  ;;  %v175_v32 = vadd.s32 8, %v264_v31 }
  0x1a   :  { %v176_v33 = vsel %vm174_vm4, %v175_v32, %v264_v31 }
  0x1b   :  { %178 = vperm.xlu2 %279, %v176_v33  }
  0x23   :  { %280 = vset.pattern.permute.xlu2 %v191_v39 }
  0x75   :  { %v179_v43 = vpop.permute.xlu2 %178 }
  0x76   :  { %vm180_vm6 = vcmp.eq.s32.totalorder %v135_v21, %v179_v43 }
  0x77   :  { %v265_v52 = vsel %vm180_vm6, 1.0, %v426_v51 }
  0x78   :  { %v187_v57 = vmul.f32 %v265_v52, %v186_v50 }
  0x94   :  { %v117_v10 = vpop.f32.mrf.mxu0  ;;  %v120_v11 = vpop.f32.mrf.mxu1 }
  0x95   :  { %v118_v12 = vadd.f32 %v282_v9, %v117_v10  ;;  %v121_v13 = vadd.f32 %v282_v9, %v120_v11 }
  0x97   :  { %284 = vtanh.f32 %v118_v12 }
  0x98   :  { %286 = vtanh.f32 %v121_v13 }
  0x9d   :  { %v285_v15 = vpop.eup %284 }
  0x9e   :  { %v128_v16 = vmul.f32 %v285_v15, %v283_v14  ;;  %v287_v17 = vpop.eup %286 }
  0x9f   :  { %v129_v18 = vmul.f32 %v287_v17, %v283_v14 }
  0xa0   :  { %130 = vadd.xlane.f32.xlu0 %v128_v16 }
  0xa8   :  { %132 = vadd.xlane.f32.xlu0 %v129_v18 }
 0x113   :  { %v131_v19 = vpop.xlane.xlu0 %130 }
 0x114   :  { %v140_v24 = vperm.slane %v131_v19, %v135_v21 }
 0x11b   :  { %v133_v23 = vpop.xlane.xlu0 %132 }
 0x11c   :  { %v141_v25 = vperm.slane %v133_v23, %v135_v21 }
 0x11e   :  { %v143_v26 = vsel %vm142_vm1, %v141_v25, %v140_v24 }
 0x11f   :  { %v145_v27 = vsel %vm137_vm2, -1e+09, %v143_v26 }
 0x120   :  { %v147_v28 = vsel %vm146_vm3, %v145_v27, -inf }
 0x121   :  { %148 = vmax.xlane.f32.xlu1 %v147_v28 }
 0x194   :  { %v149_v34 = vpop.xlane.xlu1 %148 }
 0x195   :  { %v150_v35 = vsub.f32 %v145_v27, %v149_v34 }
 0x197   :  { %v151_v36 = vmul.f32 1.442695, %v150_v35 }
 0x199   :  { %288 = vpow2.f32 %v151_v36 }
 0x19f   :  { %v289_v37 = vpop.eup %288 }
 0x1a0   :  { %v153_v38 = vsel %vm146_vm3, %v289_v37, 0.0 }
 0x1a1   :  { %154 = vadd.xlane.f32.xlu1 %v153_v38 }
 0x214   :  { %v155_v40 = vpop.xlane.xlu1 %154 }
 0x215   :  { %290 = vrcp.f32 %v155_v40  ;;  %v167_v45 = vand.u32 2147483648, %v155_v40  ;;  %v165_v47 = vand.u32 2147483647, %v155_v40  ;;  %vm161_vm7 = vweird.f32 %v155_v40 }
 0x217   :  { %v168_v49 = vor.u32 1.1754944e-38, %v167_v45  ;;  %vm166_vm9 = vcmp.eq.f32.partialorder %v165_v47, 8.507059e+37 }
 0x21b   :  { %v291_v41 = vpop.eup %290 }
 0x21c   :  { %v157_v42 = vmul.f32 %v291_v41, %v155_v40  ;;  %vm162_vm5 = vweird.f32 %v291_v41 }
 0x21d   :  { %vm163_vm8 = vmor %vm161_vm7, %vm162_vm5 }
 0x21e   :  { %v158_v44 = vsub.f32 1.0, %v157_v42 }
 0x220   :  { %v159_v46 = vmul.f32 %v291_v41, %v158_v44 }
 0x222   :  { %v160_v48 = vadd.f32 %v291_v41, %v159_v46 }
 0x224   :  { %v164_v53 = vsel %vm163_vm8, %v291_v41, %v160_v48 }
 0x225   :  { %v169_v54 = vsel %vm166_vm9, %v168_v49, %v164_v53 }
 0x226   :  { %v170_v56 = vmul.f32 %v289_v37, %v169_v54 }
 0x228   :  { %v185_v58 = vmul.f32 %v184_v55, %v170_v56  ;;  %v220_v59 = vsel %vm219_vm10, %v170_v56, 0.0 }
 0x229   :  { %221 = vst [vmem:[#allocation10] sm:$0x3] %v220_v59 }
 0x22a   :  { %v188_v60 = vadd.f32 %v187_v57, %v185_v58  ;;  %249 = dma.vmem_to_hbm [thread:$0]  %s245_s12, 32, %s247_s14, [#allocation11]  }
 0x22c   :  { %v196_v61 = vperm.slane %v188_v60, 1  ;;  %v189_v62 = vperm.slane %v188_v60, 0 }
 0x22e   :  { %201 = vperm.xlu0 %281, %v196_v61   ;;  %194 = vperm.xlu2 %280, %v189_v62  }
 0x288   :  { %v195_v63 = vpop.permute.xlu2 %194 }
 0x289   :  { %v203_v0 = vmul.f32 %v195_v63, %v488_v2 }
 0x28b   :  { %v205_v1 = vsel %vm93_vm0, %v203_v0, 0.0 }
 0x28c   :  { %v206_v3 = vrot.slane %v205_v1, 4 }
 0x28e   :  { %v207_v4 = vadd.f32 %v206_v3, %v205_v1 }
 0x290   :  { %v208_v8 = vrot.slane %v207_v4, 2 }
 0x292   :  { %v209_v11 = vadd.f32 %v208_v8, %v207_v4 }
 0x294   :  { %v210_v14 = vrot.slane %v209_v11, 1 }
 0x296   :  { %v211_v2 = vadd.f32 %v210_v14, %v209_v11 }
 0x2a0   :  { %v202_v6 = vpop.permute.xlu0 %201 }
 0x2a1   :  { %v204_v7 = vmul.f32 %v202_v6, %v490_v5 }
 0x2a3   :  { %v212_v9 = vsel %vm93_vm0, %v204_v7, 0.0 }
 0x2a4   :  { %v213_v10 = vrot.slane %v212_v9, 4 }
 0x2a6   :  { %v214_v12 = vadd.f32 %v213_v10, %v212_v9 }
 0x2a8   :  { %v215_v13 = vrot.slane %v214_v12, 2 }
 0x2aa   :  { %v216_v15 = vadd.f32 %v215_v13, %v214_v12 }
 0x2ac   :  { %v217_v16 = vrot.slane %v216_v15, 1 }
 0x2ae   :  { %v218_v17 = vadd.f32 %v217_v16, %v216_v15 }
 0x2b0   :  { %v224_v5 = vsel %vm142_vm1, %v218_v17, %v211_v2 }
 0x2b1   :  { %v226_v18 = vsel %vm93_vm0, %v224_v5, 0.0 }
 0x2b2   :  { %227 = vst [vmem:[#allocation9] sm:$0x3] %v226_v18 }
 0x2b3   :  { %238 = dma.vmem_to_hbm [thread:$0]  %s234_s15, 32, %s236_s18, [#allocation5]  }
 0x2b4   :  { %416 = dma.done.wait [#allocation5], 32  }
 0x2b5   :  { %417 = vsyncadd [#allocation5], 4294967264 }
 0x2b6   :  { %418 = dma.done.wait [#allocation11], 32  }
 0x2b7   :  { %419 = vsyncadd [#allocation11], 4294967264 }
 0x2b8   :  { %258 = vsyncpa [#allocation4], 1 }
 0x2b9   :  { %259 = vsyncpa [#allocation7], 1 }
 0x2ba   :  { %260 = vsyncpa [#allocation5], 1 }
 0x2bb   :  { %261 = vsyncpa [#allocation11], 1 }

</bundles_post_ra>
